<compile_context>
chip_gen: v5e
topology: v5e:2x2
jax: 0.10.0
libtpu: 0.0.40
codegen_flags: <defaults>
</compile_context>

<pallas_src>
from collections import namedtuple

import numpy as np
import jax
import jax.numpy as jnp
from jax.experimental import pallas as pl
from jax.experimental.pallas import tpu as pltpu


def _round_up(x, m):
    return ((x + m - 1) // m) * m


def _ppool_segmean_kernel(starts_ref, ends_ref, inv_ref, data_ref, out_ref, acc_ref):
    """One grid step: acc += W @ data_tile on the MXU.

    starts_ref: VMEM int32[TILE_G, 1]  segment start indices for this G tile
    ends_ref:   VMEM int32[TILE_G, 1]  segment end indices for this G tile
    inv_ref:    VMEM f32  [TILE_G, 1]  1/segment_size (0 for G padding rows)
    data_ref:   VMEM      [TILE_N, D]  point features for this N tile
    out_ref:    VMEM      [TILE_G, D]  pooled means (written on last N tile)
    acc_ref:    VMEM f32  [TILE_G, D]  running segment sums
    """
    k = pl.program_id(1)

    @pl.when(k == 0)
    def _init():
        acc_ref[...] = jnp.zeros_like(acc_ref)

    tile_g = acc_ref.shape[0]
    tile_n = data_ref.shape[0]

    # Global point index of every column of this data tile.
    col = jax.lax.broadcasted_iota(jnp.int32, (tile_g, tile_n), 1) + k * tile_n
    a = starts_ref[...]                      # (TILE_G, 1) broadcast over columns
    b = ends_ref[...]

    # One-hot membership matrix; 0/1 is exact in bf16 too.  The 1/size scale
    # is applied after the f32 accumulation to preserve precision.
    w = ((col >= a) & (col < b)).astype(data_ref.dtype)
    acc_ref[...] += jnp.dot(w, data_ref[...], preferred_element_type=jnp.float32)

    @pl.when(k == pl.num_programs(1) - 1)
    def _finalize():
        # Empty segment (size 0): inv = inf, sum = 0 -> NaN, matching torch.mean
        # over an empty slice.  G-padding rows use inv = 0 and stay finite.
        out_ref[...] = (acc_ref[...] * inv_ref[...]).astype(out_ref.dtype)


def ppool3d_pallas(data, obj_size):
    """Segment-mean pooling.  data: [N, *feat], obj_size: int[G] (sums to N)."""
    n = data.shape[0]
    feat_shape = data.shape[1:]
    d = int(np.prod(feat_shape)) if feat_shape else 1
    dtype = data.dtype
    data2 = data.reshape(n, d)               # keep native dtype (bf16 stays bf16)

    obj_size = obj_size.astype(jnp.int32)
    g = obj_size.shape[0]
    seg_ends = jnp.cumsum(obj_size)
    seg_starts = seg_ends - obj_size
    inv = 1.0 / obj_size.astype(jnp.float32)  # inf for empty segments -> NaN mean

    # Lane-dense feature dim; sublane-aligned, VMEM-budgeted tiles.
    d_pad = _round_up(d, 128)
    itemsize = jnp.dtype(dtype).itemsize

    tile_n = min(512, _round_up(n, 8))
    max_n_rows = max(8, ((8 * 1024 * 1024) // (d_pad * itemsize)) // 8 * 8)
    tile_n = min(tile_n, max_n_rows)

    tile_g = min(256, _round_up(g, 8))
    max_g_rows = max(8, ((4 * 1024 * 1024) // (d_pad * 4)) // 8 * 8)
    tile_g = min(tile_g, max_g_rows)

    n_pad = _round_up(n, tile_n)
    g_pad = _round_up(g, tile_g)

    data_p = jnp.pad(data2, ((0, n_pad - n), (0, d_pad - d)))
    starts_p = jnp.pad(seg_starts, (0, g_pad - g)).reshape(g_pad, 1)
    ends_p = jnp.pad(seg_ends, (0, g_pad - g)).reshape(g_pad, 1)
    inv_p = jnp.pad(inv, (0, g_pad - g)).reshape(g_pad, 1)

    num_g = g_pad // tile_g
    num_k = n_pad // tile_n

    cost = pl.CostEstimate(
        flops=2 * g_pad * n_pad * d_pad,
        transcendentals=0,
        bytes_accessed=num_g * n_pad * d_pad * itemsize
        + g_pad * d_pad * itemsize
        + 3 * g_pad * 4,
    )

    out = pl.pallas_call(
        _ppool_segmean_kernel,
        out_shape=jax.ShapeDtypeStruct((g_pad, d_pad), dtype),
        grid_spec=pltpu.PrefetchScalarGridSpec(
            num_scalar_prefetch=0,
            grid=(num_g, num_k),
            in_specs=[
                pl.BlockSpec((tile_g, 1), lambda gi, ki: (gi, 0)),        # starts
                pl.BlockSpec((tile_g, 1), lambda gi, ki: (gi, 0)),        # ends
                pl.BlockSpec((tile_g, 1), lambda gi, ki: (gi, 0)),        # 1/size
                pl.BlockSpec((tile_n, d_pad), lambda gi, ki: (ki, 0)),    # data
            ],
            out_specs=pl.BlockSpec((tile_g, d_pad), lambda gi, ki: (gi, 0)),
            scratch_shapes=[pltpu.VMEM((tile_g, d_pad), jnp.float32)],
        ),
        compiler_params=pltpu.CompilerParams(
            dimension_semantics=("parallel", "arbitrary"),
        ),
        cost_estimate=cost,
    )(starts_p, ends_p, inv_p, data_p)

    return out[:g, :d].reshape((g,) + feat_shape)


# Minimal stand-ins for the (data, point_stack) input structure of PPool3D.
PointLevel = namedtuple("PointLevel", ["obj_size"])


class PPool3DPallas:
    """Pallas port of PPool3D (pool_func = torch.mean default)."""
    # TODO(synk): only mean pooling implemented (module default torch.mean);
    # other pool_funcs (max, sum, ...) would need a different in-kernel reduction.

    def __init__(self, p):
        self.p = p

    def __call__(self, inputs):
        data, point_stack = inputs
        return ppool3d_pallas(data, point_stack[self.p].obj_size)


if __name__ == "__main__":
    key = jax.random.PRNGKey(0)
    k1, k2 = jax.random.split(key)

    # Example 1: 4 objects with 3+5+2+6 = 16 points, features (8,16) -> 128 lanes.
    obj_size = jnp.array([3, 5, 2, 6], dtype=jnp.int32)
    n_points = int(np.sum(np.asarray(obj_size)))
    data = jax.random.normal(k1, (n_points, 8, 16), dtype=jnp.float32)

    point_stack = [PointLevel(obj_size=obj_size), PointLevel(obj_size=obj_size)]
    layer = PPool3DPallas(p=1)
    out = jax.block_until_ready(layer((data, point_stack)))

    ends = np.concatenate([[0], np.cumsum(np.asarray(obj_size))])
    ref = np.stack(
        [np.asarray(data)[a:b].mean(axis=0) for a, b in zip(ends[:-1], ends[1:])]
    )
    np.testing.assert_allclose(np.asarray(out), ref, rtol=1e-5, atol=1e-5)

    # Example 2: non-lane-aligned feature dim (3*7 = 21, padded to 128 inside).
    obj_size2 = jnp.array([4, 6], dtype=jnp.int32)
    data2 = jax.random.normal(k2, (10, 3, 7), dtype=jnp.float32)
    out2 = jax.block_until_ready(ppool3d_pallas(data2, obj_size2))

    ends2 = np.concatenate([[0], np.cumsum(np.asarray(obj_size2))])
    ref2 = np.stack(
        [np.asarray(data2)[a:b].mean(axis=0) for a, b in zip(ends2[:-1], ends2[1:])]
    )
    np.testing.assert_allclose(np.asarray(out2), ref2, rtol=1e-5, atol=1e-5)

    print("KERNEL_OK")
</pallas_src>

<mosaic_0001>
module attributes {stable_mosaic.version = 11 : i64} {
  func.func @_ppool_segmean_kernel(%arg0: i32, %arg1: i32, %arg2: memref<8x1xi32, #tpu.memory_space<vmem>>, %arg3: memref<8x1xi32, #tpu.memory_space<vmem>>, %arg4: memref<8x1xf32, #tpu.memory_space<vmem>>, %arg5: memref<16x128xf32, #tpu.memory_space<vmem>>, %arg6: memref<8x128xf32, #tpu.memory_space<vmem>>, %arg7: memref<8x128xf32, #tpu.memory_space<vmem>>) attributes {dimension_semantics = [#tpu.dimension_semantics<parallel>, #tpu.dimension_semantics<arbitrary>], iteration_bounds = array<i64: 1, 1>, scalar_prefetch = 0 : i64, scratch_operands = 1 : i64, tpu.core_type = #tpu.core_type<tc>, window_params = [{transform_indices = @transform_0, window_bounds = array<i64: 8, 1>}, {transform_indices = @transform_1, window_bounds = array<i64: 8, 1>}, {transform_indices = @transform_2, window_bounds = array<i64: 8, 1>}, {transform_indices = @transform_3, window_bounds = array<i64: 16, 128>}, {transform_indices = @transform_4, window_bounds = array<i64: 8, 128>}]} {
    %c0_i32 = arith.constant 0 : i32
    %0 = arith.cmpi eq, %arg1, %c0_i32 : i32
    %1 = arith.extui %0 : i1 to i32
    %c0_i32_0 = arith.constant 0 : i32
    %2 = arith.cmpi ne, %1, %c0_i32_0 : i32
    scf.if %2 {
      %cst_12 = arith.constant 0.000000e+00 : f32
      %24 = vector.broadcast %cst_12 : f32 to vector<8x128xf32>
      %c0_13 = arith.constant 0 : index
      %c0_14 = arith.constant 0 : index
      %25 = vector.load %arg7[%c0_13, %c0_14] : memref<8x128xf32, #tpu.memory_space<vmem>>, vector<8x128xf32>
      tpu.vector_store %arg7[%c0_13, %c0_14], %24 {strides = array<i32>} : memref<8x128xf32, #tpu.memory_space<vmem>>, vector<8x128xf32>,
    } else {
    }
    %3 = tpu.iota {dimensions = array<i32: 1>} : vector<8x16xi32>
    %c16_i32 = arith.constant 16 : i32
    %4 = arith.muli %arg1, %c16_i32 : i32
    %5 = vector.broadcast %4 : i32 to vector<8x16xi32>
    %6 = arith.addi %3, %5 : vector<8x16xi32>
    %c0 = arith.constant 0 : index
    %c0_1 = arith.constant 0 : index
    %7 = vector.load %arg2[%c0, %c0_1] : memref<8x1xi32, #tpu.memory_space<vmem>>, vector<8x1xi32>
    %c0_2 = arith.constant 0 : index
    %c0_3 = arith.constant 0 : index
    %8 = vector.load %arg3[%c0_2, %c0_3] : memref<8x1xi32, #tpu.memory_space<vmem>>, vector<8x1xi32>
    %9 = vector.broadcast %7 : vector<8x1xi32> to vector<8x16xi32>
    %10 = arith.cmpi sge, %6, %9 : vector<8x16xi32>
    %11 = vector.broadcast %8 : vector<8x1xi32> to vector<8x16xi32>
    %12 = arith.cmpi slt, %6, %11 : vector<8x16xi32>
    %13 = arith.andi %10, %12 : vector<8x16xi1>
    %14 = arith.extui %13 : vector<8x16xi1> to vector<8x16xi32>
    %15 = arith.sitofp %14 : vector<8x16xi32> to vector<8x16xf32>
    %c0_4 = arith.constant 0 : index
    %c0_5 = arith.constant 0 : index
    %16 = vector.load %arg7[%c0_4, %c0_5] : memref<8x128xf32, #tpu.memory_space<vmem>>, vector<8x128xf32>
    %c0_6 = arith.constant 0 : index
    %c0_7 = arith.constant 0 : index
    %17 = vector.load %arg5[%c0_6, %c0_7] : memref<16x128xf32, #tpu.memory_space<vmem>>, vector<16x128xf32>
    %cst = arith.constant dense<0.000000e+00> : vector<8x128xf32>
    %18 = tpu.matmul %15, %17, %cst {dimension_numbers = #tpu.dot_dimension_numbers<[1], [0], [0], [1], [0, 0, 1, 1], [], []>} : vector<8x16xf32>, vector<16x128xf32>, vector<8x128xf32> -> vector<8x128xf32>
    %19 = arith.addf %16, %18 : vector<8x128xf32>
    %c0_8 = arith.constant 0 : index
    %c0_9 = arith.constant 0 : index
    %20 = vector.load %arg7[%c0_8, %c0_9] : memref<8x128xf32, #tpu.memory_space<vmem>>, vector<8x128xf32>
    tpu.vector_store %arg7[%c0_8, %c0_9], %19 {strides = array<i32>} : memref<8x128xf32, #tpu.memory_space<vmem>>, vector<8x128xf32>,
    %c0_i32_10 = arith.constant 0 : i32
    %21 = arith.cmpi eq, %arg1, %c0_i32_10 : i32
    %22 = arith.extui %21 : i1 to i32
    %c0_i32_11 = arith.constant 0 : i32
    %23 = arith.cmpi ne, %22, %c0_i32_11 : i32
    scf.if %23 {
      %c0_12 = arith.constant 0 : index
      %c0_13 = arith.constant 0 : index
      %24 = vector.load %arg7[%c0_12, %c0_13] : memref<8x128xf32, #tpu.memory_space<vmem>>, vector<8x128xf32>
      %c0_14 = arith.constant 0 : index
      %c0_15 = arith.constant 0 : index
      %25 = vector.load %arg4[%c0_14, %c0_15] : memref<8x1xf32, #tpu.memory_space<vmem>>, vector<8x1xf32>
      %26 = vector.broadcast %25 : vector<8x1xf32> to vector<8x128xf32>
      %27 = arith.mulf %24, %26 : vector<8x128xf32>
      %c0_16 = arith.constant 0 : index
      %c0_17 = arith.constant 0 : index
      %28 = vector.load %arg6[%c0_16, %c0_17] : memref<8x128xf32, #tpu.memory_space<vmem>>, vector<8x128xf32>
      tpu.vector_store %arg6[%c0_16, %c0_17], %27 {strides = array<i32>} : memref<8x128xf32, #tpu.memory_space<vmem>>, vector<8x128xf32>,
    } else {
    }
    return
  }
  func.func @transform_0(%arg0: i32, %arg1: i32) -> (i32, i32) {
    %c0_i32 = arith.constant 0 : i32
    %c0_i32_0 = arith.constant 0 : i32
    return %arg0, %c0_i32 : i32, i32
  }
  func.func @transform_1(%arg0: i32, %arg1: i32) -> (i32, i32) {
    %c0_i32 = arith.constant 0 : i32
    %c0_i32_0 = arith.constant 0 : i32
    return %arg0, %c0_i32 : i32, i32
  }
  func.func @transform_2(%arg0: i32, %arg1: i32) -> (i32, i32) {
    %c0_i32 = arith.constant 0 : i32
    %c0_i32_0 = arith.constant 0 : i32
    return %arg0, %c0_i32 : i32, i32
  }
  func.func @transform_3(%arg0: i32, %arg1: i32) -> (i32, i32) {
    %c0_i32 = arith.constant 0 : i32
    %c0_i32_0 = arith.constant 0 : i32
    return %arg1, %c0_i32 : i32, i32
  }
  func.func @transform_4(%arg0: i32, %arg1: i32) -> (i32, i32) {
    %c0_i32 = arith.constant 0 : i32
    %c0_i32_0 = arith.constant 0 : i32
    return %arg0, %c0_i32 : i32, i32
  }
}

</mosaic_0001>

<bundles_post_ra>
// kernel: tpu_custom_call.1
= control target key start
LH: loop header
LB: loop body
LE: loop exit
PB: predicated region body
PF: predicated region fallthrough
CT: control target
= control target key end

     0   :  { %s177_s0 = inlined_call_operand.vmem [shape: s32[8,1], index: 0, kind: input, shape index: {}]   ;;  %s178_s1 = inlined_call_operand.vmem [shape: s32[8,1], index: 1, kind: input, shape index: {}]   ;;  %s179_s2 = inlined_call_operand.vmem [shape: f32[8,1], index: 2, kind: input, shape index: {}]   ;;  %s180_s3 = inlined_call_operand.vmem [shape: f32[16,128], index: 3, kind: input, shape index: {}]   ;;  %s181_s4 = inlined_call_operand.hbm [shape: f32[8,128], index: 4, kind: output, shape index: {}]  }
   0x1   :  { %v28_v0 = vld [vmem:[%s177_s0] sm:$0xff] }
   0x2   :  { %9 = vsyncpa [#allocation4], 0  ;;  %v131_v1 = vmov 0   ;;  %v29_v2 = vld [vmem:[%s178_s1] sm:$0xff]  ;;  %v43_v3 = vld [vmem:[%s180_s3 + $0x8] sm:$0xff]  ;;  %v23_v7 = vlaneseq  ;;  %vm44_vm2 = vcmask 130048  }
   0x3   :  { %103 = vset.pattern.permute.xlu0 %v131_v1  ;;  %104 = vset.pattern.permute.xlu1 %v131_v1  ;;  %v42_v4 = vld [vmem:[%s180_s3] sm:$0xff]  ;;  %v132_v10 = vmov 0.0   ;;  %s133_s1 = smov [#allocation3]   ;;  %s89_s26 = sshll.u32 %s181_s4, 4  ;;  %s90_s26 = int_to_ptr.hbm [resolvable:$true] %s89_s26 }
   0x4   :  { %31 = vperm.xlu0 %103, %v28_v0   ;;  %62 = vmatpush.msra.mxu0 %v43_v3  ;;  %v74_v5 = vld [vmem:[%s179_s2] sm:$0xff]  ;;  %v24_v8 = vand.u32 127, %v23_v7  ;;  %s87_s3 = sshll.u32 %s133_s1, 4  ;;  %s88_s3 = int_to_ptr.vmem [resolvable:$true] %s87_s3 }
   0x5   :  { %77 = vperm.xlu1 %104, %v74_v5  }
   0x6   :  { %63 = vmatpush.msra.mxu0 %v42_v4 }
   0xc   :  { %35 = vperm.xlu0 %103, %v29_v2  }
  0x76   :  { %v32_v6 = vpop.permute.xlu0 %31 }
  0x77   :  { %vm33_vm0 = vcmp.ge.s32.totalorder %v24_v8, %v32_v6  ;;  %v78_v12 = vpop.permute.xlu1 %77 }
  0x7e   :  { %v36_v9 = vpop.permute.xlu0 %35 }
  0x7f   :  { %vm37_vm1 = vcmp.lt.s32.totalorder %v24_v8, %v36_v9 }
  0x80   :  { %vm38_vm3 = vmand %vm33_vm0, %vm37_vm1 }
  0x81   :  { %v98_v11 = vsel %vm38_vm3, 1.0, %v132_v10 }
  0x82   :  { %99 = vmatmul.msk.f32.vlgmr.msra.gmra.mxu0 %vm44_vm2, %v98_v11 }
  0xff   :  { %v65_v13 = vpop.f32.mrf.mxu0 }
 0x100   :  { %v80_v14 = vmul.f32 %v78_v12, %v65_v13 }
 0x102   :  { %81 = vst [vmem:[#allocation3] sm:$0xff] %v80_v14 }
 0x103   :  { %92 = dma.vmem_to_hbm [thread:$0]  %s88_s3, 128, %s90_s26, [#allocation4]  }
 0x104   :  { %129 = dma.done.wait [#allocation4], 128  }
 0x105   :  { %130 = vsyncadd [#allocation4], 4294967168 }
 0x106   :  { %97 = vsyncpa [#allocation4], 1 }

</bundles_post_ra>
